<compile_context>
chip_gen: v6e
topology: v6e:2x2x1
jax: 0.10.0
libtpu: 0.0.40
codegen_flags: <defaults>
</compile_context>

<pallas_src>
import functools

import jax
import jax.numpy as jnp
from jax import lax
from jax.experimental import pallas as pl
from jax.experimental.pallas import tpu as pltpu

_LANES = 128
_TILE_BYTES = 2 * 1024 * 1024        # ~2 MiB per pipeline buffer (roofline sweet spot)
_VMEM_LIMIT = 32 * 1024 * 1024       # in(x2)+out(x2)+bits temp <= ~16 MiB; safe everywhere


def _sublanes(dtype):
    """Sublane granularity: 8 rows (4-byte), 16 (2-byte), 32 (1-byte) — packed dtypes."""
    itemsize = jnp.dtype(dtype).itemsize
    return 8 * max(1, 4 // itemsize)


def _max_block_rows(dtype):
    itemsize = jnp.dtype(dtype).itemsize
    rows = _TILE_BYTES // (_LANES * itemsize)
    s = _sublanes(dtype)
    return max(s, (rows // s) * s)


def _row_semantics(grid_size):
    # On v7x, CORE_PARALLEL actually shards the row grid across the 2 TensorCores
    # (plain "parallel" is a near-no-op in codegen); per-tile PRNG seeding keeps
    # the noise distinct per tile, so the split is correctness-safe.
    try:
        kind = jax.devices()[0].device_kind.lower()
    except Exception:
        kind = ""
    if (grid_size >= 2 and hasattr(pltpu, "CORE_PARALLEL")
            and ("v7" in kind or "7x" in kind)):
        return (pltpu.CORE_PARALLEL,)
    return ("parallel",)


def _use_hw_prng():
    # pltpu.prng_seed / prng_random_bits only lower under Mosaic (real TPU).
    # TODO(synk): under pltpu.force_tpu_interpret_mode() on a TPU host this still
    # picks the HW path; pass interpret explicitly there if needed.
    if jax.default_backend() != "tpu":
        return False
    if getattr(jax.config, "jax_pallas_call_interpret", False):
        return False
    return True


# ----------------------------- kernels --------------------------------------


def _minmax_kernel(img_ref, mm_ref, *, nrows, block_rows):
    """Fused per-lane (min, max) partials, accumulated across the row grid."""
    i = pl.program_id(0)
    x = img_ref[...]
    if nrows % block_rows != 0:
        # Ragged final block: replace out-of-bounds rows with row 0 of the tile
        # (always in-bounds) so they cannot pollute the reduction.
        row_ids = i * block_rows + lax.broadcasted_iota(jnp.int32, x.shape, 0)
        x = jnp.where(row_ids < nrows, x, x[0:1, :])
    tmin = jnp.min(x, axis=0, keepdims=True)
    tmax = jnp.max(x, axis=0, keepdims=True)

    @pl.when(i == 0)
    def _():
        mm_ref[0:1, :] = tmin
        mm_ref[1:2, :] = tmax

    @pl.when(i > 0)
    def _():
        mm_ref[0:1, :] = jnp.minimum(mm_ref[0:1, :], tmin)
        mm_ref[1:2, :] = jnp.maximum(mm_ref[1:2, :], tmax)


def _salt_pepper_select(x, bits_u32, minmax_ref, lo_thresh, hi_thresh):
    """Two-sided select on raw uint32 bits.

    Matches the torch order: `img[u < noise] = min` first, `img[u > 1-noise] = max`
    second (max wins on overlap).  Thresholds are truncating int(noise * 2**32):
    bias ~1e-9, and noise=1.0 leaves only the bit pattern 0xFFFFFFFF unselected.
    """
    xmin = minmax_ref[0].astype(x.dtype)
    xmax = minmax_ref[1].astype(x.dtype)
    noisy = jnp.where(bits_u32 < jnp.uint32(lo_thresh), xmin, x)       # u < noise
    noisy = jnp.where(bits_u32 > jnp.uint32(hi_thresh), xmax, noisy)   # u > 1 - noise
    return noisy


def _snp_kernel_prng(minmax_ref, seed_ref, img_ref, out_ref, *, lo_thresh, hi_thresh):
    # Per-tile seed so every grid step (and every core under CORE_PARALLEL)
    # draws distinct noise; bits drawn at tile shape only.
    pltpu.prng_seed(seed_ref[0] + pl.program_id(0))
    bits = pltpu.bitcast(pltpu.prng_random_bits(img_ref.shape), jnp.uint32)
    out_ref[...] = _salt_pepper_select(img_ref[...], bits, minmax_ref,
                                       lo_thresh, hi_thresh)


def _snp_kernel_bits(minmax_ref, img_ref, bits_ref, out_ref, *, lo_thresh, hi_thresh):
    # Off-TPU fallback: random bits streamed in.  NOTE: different random stream
    # than the HW-PRNG path, so outputs differ across backends for the same key.
    out_ref[...] = _salt_pepper_select(img_ref[...], bits_ref[...], minmax_ref,
                                       lo_thresh, hi_thresh)


# ----------------------------- host wrapper ---------------------------------


def _apply_noise(img, key, noise):
    orig_shape = img.shape
    dtype = img.dtype
    n = img.size

    flat = img.reshape(-1)                          # contiguous -> bitcast, no copy
    gran = _sublanes(dtype) * _LANES
    n_main = (n // gran) * gran                     # aligned prefix handled in-kernel

    lo_thresh = min(int(noise * 2 ** 32), 2 ** 32 - 1)
    hi_thresh = min(int((1.0 - noise) * 2 ** 32), 2 ** 32 - 1)

    seed_key, tail_key = jax.random.split(key)

    main = flat[:n_main]
    tail = flat[n_main:]                            # < sublanes*128 elements

    out_main = None
    if n_main > 0:
        x2d = main.reshape(-1, _LANES)
        rows = x2d.shape[0]
        block_rows = min(_max_block_rows(dtype), rows)
        grid = (pl.cdiv(rows, block_rows),)
        tile_spec = pl.BlockSpec((block_rows, _LANES), lambda i: (i, 0))

        # ---- pass 1: fused global (min, max) — single HBM read --------------
        mm = pl.pallas_call(
            functools.partial(_minmax_kernel, nrows=rows, block_rows=block_rows),
            out_shape=jax.ShapeDtypeStruct((2, _LANES), dtype),
            grid=grid,
            in_specs=[tile_spec],
            out_specs=pl.BlockSpec((2, _LANES), lambda i: (0, 0)),
            compiler_params=pltpu.CompilerParams(
                dimension_semantics=("arbitrary",),
                vmem_limit_bytes=_VMEM_LIMIT),
        )(x2d)
        xmin = jnp.min(mm[0])
        xmax = jnp.max(mm[1])
        if tail.size:
            xmin = jnp.minimum(xmin, jnp.min(tail))
            xmax = jnp.maximum(xmax, jnp.max(tail))
    else:
        xmin = jnp.min(tail)
        xmax = jnp.max(tail)

    # min/max ride in SMEM as 32-bit scalars and are cast back to the native
    # dtype per tile; int32 carry keeps integer images exact.
    # TODO(synk): uint32 values > 2**31 would wrap in the int32 carry.
    carry_dt = jnp.int32 if jnp.issubdtype(dtype, jnp.integer) else jnp.float32
    minmax_smem = jnp.stack([xmin, xmax]).astype(carry_dt)

    if n_main > 0:
        # ---- pass 2: streaming salt/pepper select ---------------------------
        if _use_hw_prng():
            seed = jax.random.randint(seed_key, (1,), 0, 2 ** 31 - 1, dtype=jnp.int32)
            out2d = pl.pallas_call(
                functools.partial(_snp_kernel_prng,
                                  lo_thresh=lo_thresh, hi_thresh=hi_thresh),
                out_shape=jax.ShapeDtypeStruct(x2d.shape, dtype),
                grid=grid,
                in_specs=[
                    pl.BlockSpec(memory_space=pltpu.SMEM),   # minmax (2,)
                    pl.BlockSpec(memory_space=pltpu.SMEM),   # seed   (1,)
                    tile_spec,                               # image tiles (VMEM)
                ],
                out_specs=tile_spec,
                input_output_aliases={2: 0},                 # in-place (donate img)
                compiler_params=pltpu.CompilerParams(
                    dimension_semantics=_row_semantics(grid[0]),
                    vmem_limit_bytes=_VMEM_LIMIT),
            )(minmax_smem, seed, x2d)
        else:
            bits = jax.random.bits(seed_key, x2d.shape, dtype=jnp.uint32)
            out2d = pl.pallas_call(
                functools.partial(_snp_kernel_bits,
                                  lo_thresh=lo_thresh, hi_thresh=hi_thresh),
                out_shape=jax.ShapeDtypeStruct(x2d.shape, dtype),
                grid=grid,
                in_specs=[
                    pl.BlockSpec(memory_space=pltpu.SMEM),
                    tile_spec,
                    tile_spec,
                ],
                out_specs=tile_spec,
                compiler_params=pltpu.CompilerParams(
                    dimension_semantics=("arbitrary",),
                    vmem_limit_bytes=_VMEM_LIMIT),
            )(minmax_smem, x2d, bits)
        out_main = out2d.reshape(-1)

    if tail.size:
        # Tiny unaligned tail (< sublanes*128 elements): fix with an XLA where
        # instead of jnp.pad + slice round-trips over the whole image.
        u = jax.random.uniform(tail_key, tail.shape, dtype=jnp.float32)
        tail_out = jnp.where(u < jnp.float32(noise), xmin.astype(dtype), tail)
        tail_out = jnp.where(u > jnp.float32(1.0 - noise), xmax.astype(dtype), tail_out)
        out_flat = tail_out if out_main is None else jnp.concatenate([out_main, tail_out])
    else:
        out_flat = out_main

    return out_flat.reshape(orig_shape)


def salt_and_pepper(img, key, probability=1.0, noise=0.1):
    """Functional JAX/Pallas equivalent of SaltAndPepper.forward.

    Not in-place like the torch module, but the noise kernel aliases its image
    input with its output, so donating `img` at the jit boundary recovers the
    in-place behaviour (no extra HBM allocation / copy).
    """
    gate_key, noise_key = jax.random.split(key)
    # `if self.probability > torch.rand(1)` -> Bernoulli gate at the top level;
    # when the gate is off the noise pass (and its HBM traffic) is skipped.
    gate = jnp.float32(probability) > jax.random.uniform(gate_key, (), dtype=jnp.float32)
    return lax.cond(gate,
                    lambda im: _apply_noise(im, noise_key, noise),
                    lambda im: im,
                    img)


if __name__ == "__main__":
    key = jax.random.PRNGKey(0)
    k_img, k_noise = jax.random.split(key)

    # C x W x H image, small deterministic shape
    img = jax.random.uniform(k_img, (4, 16, 16), dtype=jnp.float32)
    ref_min = float(jnp.min(img))
    ref_max = float(jnp.max(img))

    fn = jax.jit(functools.partial(salt_and_pepper, probability=1.0, noise=0.1),
                 donate_argnums=(0,))
    out = jax.block_until_ready(fn(img, k_noise))

    # sanity checks: shape/dtype preserved, values stay within [min, max]
    assert out.shape == (4, 16, 16) and out.dtype == jnp.float32
    assert bool(jnp.all(out >= ref_min)) and bool(jnp.all(out <= ref_max))

    print("KERNEL_OK")
</pallas_src>

<mosaic_0001>
module attributes {stable_mosaic.version = 11 : i64} {
  func.func @_snp_kernel_bits(%arg0: i32, %arg1: memref<2xf32, #tpu.memory_space<smem>>, %arg2: memref<8x128xf32, #tpu.memory_space<vmem>>, %arg3: memref<8x128xi32, #tpu.memory_space<vmem>>, %arg4: memref<8x128xf32, #tpu.memory_space<vmem>>) attributes {dimension_semantics = [#tpu.dimension_semantics<arbitrary>], iteration_bounds = array<i64: 1>, scalar_prefetch = 0 : i64, scratch_operands = 0 : i64, tpu.core_type = #tpu.core_type<tc>, window_params = [{transform_indices = @transform_0, window_bounds = array<i64: 2>}, {transform_indices = @transform_1, window_bounds = array<i64: 8, 128>}, {transform_indices = @transform_2, window_bounds = array<i64: 8, 128>}, {transform_indices = @transform_3, window_bounds = array<i64: 8, 128>}]} {
    %c0 = arith.constant 0 : index
    %c0_0 = arith.constant 0 : index
    %0 = vector.load %arg2[%c0, %c0_0] : memref<8x128xf32, #tpu.memory_space<vmem>>, vector<8x128xf32>
    %c0_1 = arith.constant 0 : index
    %c0_2 = arith.constant 0 : index
    %1 = vector.load %arg3[%c0_1, %c0_2] : memref<8x128xi32, #tpu.memory_space<vmem>>, vector<8x128xi32>
    %c0_3 = arith.constant 0 : index
    %2 = memref.load %arg1[%c0_3] : memref<2xf32, #tpu.memory_space<smem>>
    %c1 = arith.constant 1 : index
    %3 = memref.load %arg1[%c1] : memref<2xf32, #tpu.memory_space<smem>>
    %c429496729_i32 = arith.constant 429496729 : i32
    %4 = vector.broadcast %c429496729_i32 : i32 to vector<8x128xi32>
    %5 = arith.cmpi ult, %1, %4 : vector<8x128xi32>
    %6 = vector.broadcast %2 : f32 to vector<8x128xf32>
    %7 = arith.select %5, %6, %0 : vector<8x128xi1>, vector<8x128xf32>
    %c-429496730_i32 = arith.constant -429496730 : i32
    %8 = vector.broadcast %c-429496730_i32 : i32 to vector<8x128xi32>
    %9 = arith.cmpi ugt, %1, %8 : vector<8x128xi32>
    %10 = vector.broadcast %3 : f32 to vector<8x128xf32>
    %11 = arith.select %9, %10, %7 : vector<8x128xi1>, vector<8x128xf32>
    %c0_4 = arith.constant 0 : index
    %c0_5 = arith.constant 0 : index
    %12 = vector.load %arg4[%c0_4, %c0_5] : memref<8x128xf32, #tpu.memory_space<vmem>>, vector<8x128xf32>
    tpu.vector_store %arg4[%c0_4, %c0_5], %11 {strides = array<i32>} : memref<8x128xf32, #tpu.memory_space<vmem>>, vector<8x128xf32>,
    return
  }
  func.func @transform_0(%arg0: i32) -> i32 {
    %c0_i32 = arith.constant 0 : i32
    %c0_i32_0 = arith.constant 0 : i32
    return %c0_i32 : i32
  }
  func.func @transform_1(%arg0: i32) -> (i32, i32) {
    %c0_i32 = arith.constant 0 : i32
    %c0_i32_0 = arith.constant 0 : i32
    return %arg0, %c0_i32 : i32, i32
  }
  func.func @transform_2(%arg0: i32) -> (i32, i32) {
    %c0_i32 = arith.constant 0 : i32
    %c0_i32_0 = arith.constant 0 : i32
    return %arg0, %c0_i32 : i32, i32
  }
  func.func @transform_3(%arg0: i32) -> (i32, i32) {
    %c0_i32 = arith.constant 0 : i32
    %c0_i32_0 = arith.constant 0 : i32
    return %arg0, %c0_i32 : i32, i32
  }
}

module attributes {stable_mosaic.version = 11 : i64} {
  func.func @_minmax_kernel(%arg0: i32, %arg1: memref<8x128xf32, #tpu.memory_space<vmem>>, %arg2: memref<2x128xf32, #tpu.memory_space<vmem>>) attributes {dimension_semantics = [#tpu.dimension_semantics<arbitrary>], iteration_bounds = array<i64: 1>, scalar_prefetch = 0 : i64, scratch_operands = 0 : i64, tpu.core_type = #tpu.core_type<tc>, window_params = [{transform_indices = @transform_0, window_bounds = array<i64: 8, 128>}, {pipeline_mode = #tpu.pipeline_mode<synchronous>, transform_indices = @transform_1, window_bounds = array<i64: 2, 128>}]} {
    %c0 = arith.constant 0 : index
    %c0_0 = arith.constant 0 : index
    %0 = vector.load %arg1[%c0, %c0_0] : memref<8x128xf32, #tpu.memory_space<vmem>>, vector<8x128xf32>
    %cst = arith.constant dense<0x7F800000> : vector<128xf32>
    %1 = vector.multi_reduction <minimumf>, %0, %cst [0] : vector<8x128xf32> to vector<128xf32>
    %2 = vector.shape_cast %1 : vector<128xf32> to vector<1x128xf32>
    %cst_1 = arith.constant dense<0xFF800000> : vector<128xf32>
    %3 = vector.multi_reduction <maximumf>, %0, %cst_1 [0] : vector<8x128xf32> to vector<128xf32>
    %4 = vector.shape_cast %3 : vector<128xf32> to vector<1x128xf32>
    %c0_i32 = arith.constant 0 : i32
    %5 = arith.cmpi eq, %arg0, %c0_i32 : i32
    %6 = arith.extui %5 : i1 to i32
    %c0_i32_2 = arith.constant 0 : i32
    %7 = arith.cmpi ne, %6, %c0_i32_2 : i32
    scf.if %7 {
      %c0_5 = arith.constant 0 : index
      %c0_6 = arith.constant 0 : index
      %11 = vector.load %arg2[%c0_5, %c0_6] : memref<2x128xf32, #tpu.memory_space<vmem>>, vector<1x128xf32>
      tpu.vector_store %arg2[%c0_5, %c0_6], %2 {strides = array<i32>} : memref<2x128xf32, #tpu.memory_space<vmem>>, vector<1x128xf32>,
      %c1 = arith.constant 1 : index
      %c0_7 = arith.constant 0 : index
      %12 = vector.load %arg2[%c1, %c0_7] : memref<2x128xf32, #tpu.memory_space<vmem>>, vector<1x128xf32>
      tpu.vector_store %arg2[%c1, %c0_7], %4 {strides = array<i32>} : memref<2x128xf32, #tpu.memory_space<vmem>>, vector<1x128xf32>,
    } else {
    }
    %c0_i32_3 = arith.constant 0 : i32
    %8 = arith.cmpi sgt, %arg0, %c0_i32_3 : i32
    %9 = arith.extui %8 : i1 to i32
    %c0_i32_4 = arith.constant 0 : i32
    %10 = arith.cmpi ne, %9, %c0_i32_4 : i32
    scf.if %10 {
      %c0_5 = arith.constant 0 : index
      %c0_6 = arith.constant 0 : index
      %11 = vector.load %arg2[%c0_5, %c0_6] : memref<2x128xf32, #tpu.memory_space<vmem>>, vector<1x128xf32>
      %12 = arith.minimumf %11, %2 : vector<1x128xf32>
      %c0_7 = arith.constant 0 : index
      %c0_8 = arith.constant 0 : index
      %13 = vector.load %arg2[%c0_7, %c0_8] : memref<2x128xf32, #tpu.memory_space<vmem>>, vector<1x128xf32>
      tpu.vector_store %arg2[%c0_7, %c0_8], %12 {strides = array<i32>} : memref<2x128xf32, #tpu.memory_space<vmem>>, vector<1x128xf32>,
      %c1 = arith.constant 1 : index
      %c0_9 = arith.constant 0 : index
      %14 = vector.load %arg2[%c1, %c0_9] : memref<2x128xf32, #tpu.memory_space<vmem>>, vector<1x128xf32>
      %15 = arith.maximumf %14, %4 : vector<1x128xf32>
      %c1_10 = arith.constant 1 : index
      %c0_11 = arith.constant 0 : index
      %16 = vector.load %arg2[%c1_10, %c0_11] : memref<2x128xf32, #tpu.memory_space<vmem>>, vector<1x128xf32>
      tpu.vector_store %arg2[%c1_10, %c0_11], %15 {strides = array<i32>} : memref<2x128xf32, #tpu.memory_space<vmem>>, vector<1x128xf32>,
    } else {
    }
    return
  }
  func.func @transform_0(%arg0: i32) -> (i32, i32) {
    %c0_i32 = arith.constant 0 : i32
    %c0_i32_0 = arith.constant 0 : i32
    return %arg0, %c0_i32 : i32, i32
  }
  func.func @transform_1(%arg0: i32) -> (i32, i32) {
    %c0_i32 = arith.constant 0 : i32
    %c0_i32_0 = arith.constant 0 : i32
    %c0_i32_1 = arith.constant 0 : i32
    return %c0_i32, %c0_i32_0 : i32, i32
  }
}

</mosaic_0001>

<bundles_post_ra>
// kernel: branch_1_fun.3
= control target key start
LH: loop header
LB: loop body
LE: loop exit
PB: predicated region body
PF: predicated region fallthrough
CT: control target
= control target key end

     0   :  { %8 = vsyncpa [#allocation3], 0  ;;  %s92_s0 = inlined_call_operand.vmem [shape: f32[2], index: 0, kind: input, shape index: {}]   ;;  %s93_s1 = inlined_call_operand.vmem [shape: f32[8,128], index: 1, kind: input, shape index: {}]   ;;  %s94_s2 = inlined_call_operand.vmem [shape: u32[8,128], index: 2, kind: input, shape index: {}]   ;;  %s95_s3 = inlined_call_operand.vmem [shape: f32[8,128], index: 3, kind: output, shape index: {}]  }
   0x1   :  { %s15_s14 = sshll.u32 %s92_s0, 4  ;;  %s16_s14 = int_to_ptr.vmem [resolvable:$true] %s15_s14 }
   0x2   :  { %s45_s15 = scalar_lea.vmem %s16_s14, 16  ;;  %p50_p1 = scmp.lt.s32.totalorder %s16_s14, %s16_s14 }
   0x3   :  { %p46_p0 = scmp.ne.s32.totalorder %s16_s14, %s45_s15  ;;  %p51_p2 = scmp.lt.s32.totalorder %s45_s15, %s45_s15 }
   0x5   :  { %p52_p3 = por %p51_p2, %p50_p1 }
   0x7   :  { %p53_p4 = pnand %p52_p3, %p46_p0 }
   0x9   :  { %56 = shalt.err (!%p53_p4)
}
   0xa   :  { %s59_s16 = smov [#allocation2]  }
   0xb   :  { %18 = dma.vmem_to_smem %s16_s14, 16, %s59_s16, [#allocation3]  }
   0xc   :  { %57 = dma.done.wait [#allocation3], 16  }
   0xd   :  { %58 = vsyncadd [#allocation3], 4294967280 }
   0xe   :  { %26 = sfence }
   0xf   :  { %s29_s17 = sld [smem:[#allocation2]]  ;;  %v28_v0 = vld [vmem:[%s94_s2] sm:$0xff] }
  0x10   :  { %s43_s20 = sld [smem:[#allocation2 + $0x1]]  ;;  %v27_v1 = vld [vmem:[%s93_s1] sm:$0xff]  ;;  %vm31_vm0 = vcmp.lt.u32.totalorder %v28_v0, 429496729  ;;  %vm34_vm1 = vcmp.gt.u32.totalorder %v28_v0, 3865470566 }
  0x15   :  { %v32_v2 = vstv %s29_s17 }
  0x16   :  { %v33_v3 = vsel %vm31_vm0, %v32_v2, %v27_v1  ;;  %v35_v4 = vstv %s43_s20 }
  0x17   :  { %v36_v5 = vsel %vm34_vm1, %v35_v4, %v33_v3 }
  0x18   :  { %37 = vst [vmem:[%s95_s3] sm:$0xff] %v36_v5 }
  0x19   :  { %42 = vsyncpa [#allocation3], 1 }

// kernel: branch_1_fun.2
= control target key start
LH: loop header
LB: loop body
LE: loop exit
PB: predicated region body
PF: predicated region fallthrough
CT: control target
= control target key end

     0   :  { %s60_s0 = inlined_call_operand.vmem [shape: f32[8,128], index: 0, kind: input, shape index: {}]   ;;  %s61_s1 = inlined_call_operand.vmem [shape: f32[2,128], index: 1, kind: output, shape index: {}]  }
   0x1   :  { %v8_v0 = vld [vmem:[%s60_s0] sm:$0xff] }
   0x2   :  { %v9_v1 = vrot.slane %v8_v0, 4 }
   0x4   :  { %v10_v2 = vmin.f32 %v8_v0, %v9_v1  ;;  %v16_v3 = vmax.f32 %v8_v0, %v9_v1 }
   0x6   :  { %v11_v4 = vrot.slane %v10_v2, 2  ;;  %v17_v5 = vrot.slane %v16_v3, 2 }
   0x8   :  { %v12_v6 = vmin.f32 %v10_v2, %v11_v4  ;;  %v18_v7 = vmax.f32 %v16_v3, %v17_v5 }
   0xa   :  { %v13_v8 = vrot.slane %v12_v6, 1  ;;  %v19_v9 = vrot.slane %v18_v7, 1 }
   0xc   :  { %v14_v10 = vmin.f32 %v12_v6, %v13_v8  ;;  %v20_v11 = vmax.f32 %v18_v7, %v19_v9 }
   0xe   :  { %25 = vst [vmem:[%s61_s1] sm:$0x1] %v14_v10  ;;  %26 = vst [vmem:[%s61_s1 + $0x1] sm:$0x1] %v20_v11 }

</bundles_post_ra>
